<compile_context>
chip_gen: v7x
topology: tpu7x:2x2x1
jax: 0.10.0
libtpu: 0.0.40
codegen_flags: <defaults>
</compile_context>

<pallas_src>
import jax
import jax.numpy as jnp
from jax import lax
from jax.experimental import pallas as pl
from jax.experimental.pallas import tpu as pltpu

LANES = 128
SUBLANES = 8
CHUNK_ROWS = 512            # in-kernel fold granularity: 512 x 128 x 4 B = 256 KiB f32
MIN_KERNEL_ROWS = SUBLANES  # below this, plain jnp is cheaper than a kernel launch


def _device_flags():
    """Best-effort chip detection; mis-detection is safe (vmem limit is explicit)."""
    kind = ""
    try:
        kind = jax.devices()[0].device_kind.lower().replace(" ", "")
    except Exception:
        pass
    is_v7 = ("v7" in kind) or kind.startswith("tpu7")
    is_v5e = ("v5e" in kind) or ("v5lite" in kind)
    return is_v7, is_v5e


def _make_mse_kernel(*, tile_rows, chunk_rows, tiles_per_core, rows, needs_mask,
                     two_axis):
    """Builds the kernel body with the tiling constants baked in at trace time."""
    num_full = tile_rows // chunk_rows
    rem_rows = tile_rows - num_full * chunk_rows    # static, multiple of SUBLANES

    def chunk_sum(pred_ref, real_ref, row_off, nrows, tile_start, masked):
        p = pred_ref[pl.ds(row_off, nrows), :].astype(jnp.float32)
        r = real_ref[pl.ds(row_off, nrows), :].astype(jnp.float32)
        diff = r - p
        sq = diff * diff
        if masked:
            # Only emitted for the tail/overshoot tile (gated by pl.when below).
            local = lax.broadcasted_iota(jnp.int32, (nrows, LANES), 0)
            sq = jnp.where(tile_start + row_off + local < rows, sq, 0.0)
        # Fold to one (8, 128) vreg with pure VPU adds (no cross-lane reduce).
        return jnp.sum(sq.reshape(nrows // SUBLANES, SUBLANES, LANES), axis=0)

    def accumulate(pred_ref, real_ref, tile_start, masked):
        acc = jnp.zeros((SUBLANES, LANES), jnp.float32)
        if num_full > 0:
            def body(j, a):
                off = pl.multiple_of(j * chunk_rows, SUBLANES)
                return a + chunk_sum(pred_ref, real_ref, off, chunk_rows,
                                     tile_start, masked)
            acc = lax.fori_loop(0, num_full, body, acc,
                                unroll=min(num_full, 4))
        if rem_rows > 0:
            acc = acc + chunk_sum(pred_ref, real_ref, num_full * chunk_rows,
                                  rem_rows, tile_start, masked)
        return acc

    def kernel(pred_ref, real_ref, out_ref):
        if two_axis:
            c = pl.program_id(0)   # TensorCore split (v7x only)
            i = pl.program_id(1)   # row-tile reduction axis
        else:
            c = 0
            i = pl.program_id(0)

        @pl.when(i == 0)
        def _():
            out_ref[...] = jnp.zeros_like(out_ref)

        # Unclamped global row start of this tile (>= rows on overshoot tiles,
        # which therefore mask to exactly zero contribution).
        tile_start = (c * tiles_per_core + i) * tile_rows

        if needs_mask:
            is_tail = tile_start + tile_rows > rows

            @pl.when(is_tail)
            def _():
                out_ref[...] += accumulate(pred_ref, real_ref, tile_start, True)

            @pl.when(jnp.logical_not(is_tail))
            def _():
                out_ref[...] += accumulate(pred_ref, real_ref, tile_start, False)
        else:
            out_ref[...] += accumulate(pred_ref, real_ref, tile_start, False)

    return kernel


def mse_pallas(pred, real):
    assert pred.shape == real.shape, "pred/real must have the same shape"
    n = pred.size
    assert n > 0, "empty input"

    pred_flat = pred.reshape(-1)
    real_flat = real.reshape(-1)

    n_main = (n // LANES) * LANES
    rows = n_main // LANES

    # Tiny inputs: not worth a kernel launch.
    if rows < MIN_KERNEL_ROWS:
        d = real_flat.astype(jnp.float32) - pred_flat.astype(jnp.float32)
        return jnp.sum(d * d) / n

    # Lane-dense main slab in the NATIVE dtype; no jnp.pad (the <128-element
    # lane tail, if any, is added back as a tiny jnp correction below).
    # TODO(synk): for unaligned n the [:n_main] slice still copies the slab;
    # a fully copy-free path needs memory_space=pl.ANY + manual DMA + lane mask.
    pred2d = pred_flat[:n_main].reshape(rows, LANES)
    real2d = real_flat[:n_main].reshape(rows, LANES)

    is_v7, is_v5e = _device_flags()
    itemsize = max(pred.dtype.itemsize, real.dtype.itemsize)

    # Byte-budgeted tiles: ~4 MiB of input per block per step (8192 rows f32,
    # 16384 rows bf16); 2 MiB on v5e so 2 inputs x 2 pipeline buffers stay well
    # inside its smaller default scoped VMEM.
    block_bytes = (2 << 20) if is_v5e else (4 << 20)
    row_budget = max(CHUNK_ROWS,
                     (block_bytes // (LANES * itemsize)) // CHUNK_ROWS * CHUNK_ROWS)

    if rows <= row_budget:
        tile_rows = max(SUBLANES, (rows // SUBLANES) * SUBLANES)
    else:
        tile_rows = row_budget
    chunk_rows = min(CHUNK_ROWS, tile_rows)

    num_tiles = pl.cdiv(rows, tile_rows)

    # Real 2-TensorCore split only on multi-TC chips (v7x); single-TC v5e/v6e
    # keep a plain 1-D reduction grid (no overshoot tile, no forced masking).
    num_cores = 2 if (is_v7 and num_tiles >= 2) else 1

    if num_cores == 2:
        tiles_per_core = pl.cdiv(num_tiles, num_cores)
        overshoot = (num_cores * tiles_per_core) != num_tiles
        needs_mask = (rows % tile_rows != 0) or overshoot
        last_block = num_tiles - 1

        if overshoot:
            # Clamp so the DMA never starts fully out of bounds; the in-kernel
            # row mask zeroes the re-read data on the overshoot tile.
            def in_index_map(c, i):
                return (jnp.minimum(c * tiles_per_core + i, last_block), 0)
        else:
            def in_index_map(c, i):
                return (c * tiles_per_core + i, 0)

        out_index_map = lambda c, i: (c, 0)
        grid = (num_cores, tiles_per_core)
        # TODO(synk): verify on v7x hardware (bundle/profile) that CORE_PARALLEL
        # really shards the row range across both TensorCores.
        dims = (pltpu.CORE_PARALLEL, pltpu.ARBITRARY)
        two_axis = True
    else:
        tiles_per_core = num_tiles
        needs_mask = (num_tiles * tile_rows) != rows
        in_index_map = lambda i: (i, 0)
        out_index_map = lambda i: (0, 0)
        grid = (num_tiles,)
        dims = (pltpu.ARBITRARY,)
        two_axis = False

    kernel = _make_mse_kernel(
        tile_rows=tile_rows, chunk_rows=chunk_rows, tiles_per_core=tiles_per_core,
        rows=rows, needs_mask=needs_mask, two_axis=two_axis)

    tile_bytes = tile_rows * LANES * itemsize
    out_bytes = num_cores * SUBLANES * LANES * 4
    # 2 inputs x 2 pipeline buffers + generous headroom for internal scratch.
    vmem_limit = int(4 * tile_bytes + (8 << 20))

    cost = pl.CostEstimate(
        flops=3 * n,                       # sub, mul, add per element
        transcendentals=0,
        bytes_accessed=int(n_main * (pred.dtype.itemsize + real.dtype.itemsize))
        + out_bytes,
    )

    partial = pl.pallas_call(
        kernel,
        out_shape=jax.ShapeDtypeStruct((num_cores * SUBLANES, LANES), jnp.float32),
        grid=grid,
        in_specs=[
            pl.BlockSpec((tile_rows, LANES), in_index_map),
            pl.BlockSpec((tile_rows, LANES), in_index_map),
        ],
        out_specs=pl.BlockSpec((SUBLANES, LANES), out_index_map),
        compiler_params=pltpu.CompilerParams(
            dimension_semantics=dims,
            vmem_limit_bytes=vmem_limit,
        ),
        cost_estimate=cost,
    )(pred2d, real2d)

    total = jnp.sum(partial)

    # <128-element lane tail (only when n % 128 != 0): tiny jnp correction.
    if n_main != n:
        d_tail = (real_flat[n_main:].astype(jnp.float32)
                  - pred_flat[n_main:].astype(jnp.float32))
        total = total + jnp.sum(d_tail * d_tail)

    return total / n


if __name__ == "__main__":
    key = jax.random.PRNGKey(0)
    k1, k2 = jax.random.split(key)

    # Primary check: lane-aligned NCHW input (matches the module's typical use).
    shape = (2, 4, 16, 16)
    pred = jax.random.normal(k1, shape, dtype=jnp.float32)
    real = jax.random.normal(k2, shape, dtype=jnp.float32)

    mse = mse_pallas(pred, real)
    jax.block_until_ready(mse)

    ref = jnp.mean((real - pred) ** 2)
    assert jnp.allclose(mse, ref, rtol=1e-5, atol=1e-6), (mse, ref)

    # Secondary check: unaligned size exercises the tail-tile mask + lane-tail
    # correction paths.
    shape2 = (3, 5, 7, 11)
    k3, k4 = jax.random.split(k2)
    pred2 = jax.random.normal(k3, shape2, dtype=jnp.float32)
    real2 = jax.random.normal(k4, shape2, dtype=jnp.float32)

    mse2 = mse_pallas(pred2, real2)
    jax.block_until_ready(mse2)
    ref2 = jnp.mean((real2 - pred2) ** 2)
    assert jnp.allclose(mse2, ref2, rtol=1e-5, atol=1e-6), (mse2, ref2)

    print("KERNEL_OK")
</pallas_src>

<mosaic_0001>
module attributes {stable_mosaic.version = 11 : i64} {
  func.func @kernel(%arg0: i32, %arg1: memref<16x128xf32, #tpu.memory_space<vmem>>, %arg2: memref<16x128xf32, #tpu.memory_space<vmem>>, %arg3: memref<8x128xf32, #tpu.memory_space<vmem>>) attributes {dimension_semantics = [#tpu.dimension_semantics<arbitrary>], iteration_bounds = array<i64: 1>, scalar_prefetch = 0 : i64, scratch_operands = 0 : i64, tpu.core_type = #tpu.core_type<tc>, window_params = [{transform_indices = @transform_0, window_bounds = array<i64: 16, 128>}, {transform_indices = @transform_1, window_bounds = array<i64: 16, 128>}, {pipeline_mode = #tpu.pipeline_mode<synchronous>, transform_indices = @transform_2, window_bounds = array<i64: 8, 128>}]} {
    %c0_i32 = arith.constant 0 : i32
    %0 = arith.cmpi eq, %arg0, %c0_i32 : i32
    %1 = arith.extui %0 : i1 to i32
    %c0_i32_0 = arith.constant 0 : i32
    %2 = arith.cmpi ne, %1, %c0_i32_0 : i32
    scf.if %2 {
      %cst_8 = arith.constant 0.000000e+00 : f32
      %18 = vector.broadcast %cst_8 : f32 to vector<8x128xf32>
      %c0_9 = arith.constant 0 : index
      %c0_10 = arith.constant 0 : index
      %19 = vector.load %arg3[%c0_9, %c0_10] : memref<8x128xf32, #tpu.memory_space<vmem>>, vector<8x128xf32>
      tpu.vector_store %arg3[%c0_9, %c0_10], %18 {strides = array<i32>} : memref<8x128xf32, #tpu.memory_space<vmem>>, vector<8x128xf32>,
    } else {
    }
    %c0 = arith.constant 0 : index
    %c0_1 = arith.constant 0 : index
    %3 = vector.load %arg3[%c0, %c0_1] : memref<8x128xf32, #tpu.memory_space<vmem>>, vector<8x128xf32>
    %cst = arith.constant 0.000000e+00 : f32
    %4 = vector.broadcast %cst : f32 to vector<8x128xf32>
    %c0_i32_2 = arith.constant 0 : i32
    %c16_i32 = arith.constant 16 : i32
    %5 = arith.muli %c0_i32_2, %c16_i32 : i32
    %6 = tpu.assume_multiple %5, 8 : i32
    %7 = arith.index_cast %6 : i32 to index
    %c0_3 = arith.constant 0 : index
    %8 = vector.load %arg1[%7, %c0_3] : memref<16x128xf32, #tpu.memory_space<vmem>>, vector<16x128xf32>
    %9 = arith.index_cast %6 : i32 to index
    %c0_4 = arith.constant 0 : index
    %10 = vector.load %arg2[%9, %c0_4] : memref<16x128xf32, #tpu.memory_space<vmem>>, vector<16x128xf32>
    %11 = arith.subf %10, %8 : vector<16x128xf32>
    %12 = arith.mulf %11, %11 : vector<16x128xf32>
    %13 = vector.shape_cast %12 : vector<16x128xf32> to vector<2x8x128xf32>
    %cst_5 = arith.constant dense<0.000000e+00> : vector<8x128xf32>
    %14 = vector.multi_reduction <add>, %13, %cst_5 [0] : vector<2x8x128xf32> to vector<8x128xf32>
    %15 = arith.addf %4, %14 : vector<8x128xf32>
    %c1_i32 = arith.constant 1 : i32
    %16 = arith.addf %3, %15 : vector<8x128xf32>
    %c0_6 = arith.constant 0 : index
    %c0_7 = arith.constant 0 : index
    %17 = vector.load %arg3[%c0_6, %c0_7] : memref<8x128xf32, #tpu.memory_space<vmem>>, vector<8x128xf32>
    tpu.vector_store %arg3[%c0_6, %c0_7], %16 {strides = array<i32>} : memref<8x128xf32, #tpu.memory_space<vmem>>, vector<8x128xf32>,
    return
  }
  func.func @transform_0(%arg0: i32) -> (i32, i32) {
    %c0_i32 = arith.constant 0 : i32
    %c0_i32_0 = arith.constant 0 : i32
    return %arg0, %c0_i32 : i32, i32
  }
  func.func @transform_1(%arg0: i32) -> (i32, i32) {
    %c0_i32 = arith.constant 0 : i32
    %c0_i32_0 = arith.constant 0 : i32
    return %arg0, %c0_i32 : i32, i32
  }
  func.func @transform_2(%arg0: i32) -> (i32, i32) {
    %c0_i32 = arith.constant 0 : i32
    %c0_i32_0 = arith.constant 0 : i32
    %c0_i32_1 = arith.constant 0 : i32
    return %c0_i32, %c0_i32_0 : i32, i32
  }
}

</mosaic_0001>

<bundles_post_ra>
// kernel: tpu_custom_call.1
= control target key start
LH: loop header
LB: loop body
LE: loop exit
PB: predicated region body
PF: predicated region fallthrough
CT: control target
= control target key end

     0   :  { %7 = vsyncpa [#allocation3], 0  ;;  %s208_s0 = inlined_call_operand.hbm [shape: f32[16,128], index: 0, kind: input, shape index: {}]   ;;  %s209_s1 = inlined_call_operand.hbm [shape: f32[16,128], index: 1, kind: input, shape index: {}]   ;;  %s210_s2 = inlined_call_operand.hbm [shape: f32[8,128], index: 2, kind: output, shape index: {}]  }
   0x1   :  { %8 = vsyncpa [#allocation6], 0 }
   0x2   :  { %9 = vsyncpa [#allocation4], 0  ;;  %s152_s9 = smov [#allocation2]   ;;  %s80_s13 = scalar_lea.hbm %s208_s0, 256 }
   0x3   :  { %s15_s10 = sshll.u32 %s152_s9, 4  ;;  %p81_p0 = scmp.ne.s32.totalorder %s208_s0, %s80_s13  ;;  %s16_s10 = int_to_ptr.vmem [resolvable:$true] %s15_s10 }
   0x4   :  { %p84_p1 = scmp.lt.u32.totalorder %s80_s13, %s208_s0 }
   0x6   :  { %p86_p2 = pnand %p84_p1, %p81_p0 }
   0x8   :  { %89 = shalt.err (!%p86_p2)
}
   0x9   :  { %s90_s18 = scalar_lea.vmem %s16_s10, 256  ;;  %p95_p4 = scmp.lt.s32.totalorder %s16_s10, %s16_s10 }
   0xa   :  { %p91_p3 = scmp.ne.s32.totalorder %s16_s10, %s90_s18  ;;  %p96_p5 = scmp.lt.s32.totalorder %s90_s18, %s90_s18 }
   0xc   :  { %p97_p6 = por %p96_p5, %p95_p4 }
   0xe   :  { %p98_p7 = pnand %p97_p6, %p91_p3 }
  0x10   :  { %101 = shalt.err (!%p98_p7)
}
  0x11   :  { %s153_s19 = smov 128   ;;  %s154_s20 = smov 8  }
  0x12   :  { %21 = dma.hbm_to_vmem [thread:$0]  %s208_s0, 256, %s16_s10, [#allocation3], %s153_s19, %s153_s19, %s154_s20  }
  0x13   :  { %s155_s23 = smov [#allocation5]   ;;  %s102_s27 = scalar_lea.hbm %s209_s1, 256 }
  0x14   :  { %s27_s24 = sshll.u32 %s155_s23, 4  ;;  %p103_p8 = scmp.ne.s32.totalorder %s209_s1, %s102_s27  ;;  %s28_s24 = int_to_ptr.vmem [resolvable:$true] %s27_s24 }
  0x15   :  { %p106_p9 = scmp.lt.u32.totalorder %s102_s27, %s209_s1 }
  0x17   :  { %p108_p10 = pnand %p106_p9, %p103_p8 }
  0x19   :  { %111 = shalt.err (!%p108_p10)
}
  0x1a   :  { %s112_s4 = scalar_lea.vmem %s28_s24, 256  ;;  %p117_p12 = scmp.lt.s32.totalorder %s28_s24, %s28_s24 }
  0x1b   :  { %p113_p11 = scmp.ne.s32.totalorder %s28_s24, %s112_s4  ;;  %p118_p13 = scmp.lt.s32.totalorder %s112_s4, %s112_s4 }
  0x1d   :  { %p119_p0 = por %p118_p13, %p117_p12 }
  0x1f   :  { %p120_p1 = pnand %p119_p0, %p113_p11 }
  0x21   :  { %123 = shalt.err (!%p120_p1)
}
  0x22   :  { %33 = dma.hbm_to_vmem [thread:$0]  %s209_s1, 256, %s28_s24, [#allocation6], %s153_s19, %s153_s19, %s154_s20  }
  0x23   :  { %146 = dma.done.wait [#allocation3], 256  }
  0x24   :  { %147 = vsyncadd [#allocation3], 4294967040 }
  0x25   :  { %148 = dma.done.wait [#allocation6], 256  }
  0x26   :  { %149 = vsyncadd [#allocation6], 4294967040  ;;  %v46_v0 = vld [vmem:[#allocation2] sm:$0xff]  ;;  %v47_v1 = vld [vmem:[#allocation2 + $0x8] sm:$0xff]  ;;  %s156_s6 = smov [#allocation7]  }
  0x27   :  { %v48_v2 = vld [vmem:[#allocation5] sm:$0xff]  ;;  %v49_v3 = vld [vmem:[#allocation5 + $0x8] sm:$0xff]  ;;  %s64_s7 = sshll.u32 %s156_s6, 4  ;;  %s65_s7 = int_to_ptr.vmem [resolvable:$true] %s64_s7 }
  0x28   :  { %v50_v4 = vsub.f32 %v48_v2, %v46_v0  ;;  %v51_v5 = vsub.f32 %v49_v3, %v47_v1  ;;  %s124_s8 = scalar_lea.vmem %s65_s7, 128  ;;  %p129_p3 = scmp.lt.s32.totalorder %s65_s7, %s65_s7 }
  0x29   :  { %p125_p2 = scmp.ne.s32.totalorder %s65_s7, %s124_s8  ;;  %p130_p4 = scmp.lt.s32.totalorder %s124_s8, %s124_s8 }
  0x2a   :  { %v52_v6 = vmul.f32 %v50_v4, %v50_v4  ;;  %v53_v7 = vmul.f32 %v51_v5, %v51_v5 }
  0x2b   :  { %p131_p5 = por %p130_p4, %p129_p3 }
  0x2c   :  { %v54_v8 = vadd.f32 %v53_v7, %v52_v6 }
  0x2d   :  { %p132_p6 = pnand %p131_p5, %p125_p2 }
  0x2e   :  { %57 = vst [vmem:[#allocation7] sm:$0xff] %v54_v8 }
  0x2f   :  { %135 = shalt.err (!%p132_p6)
}
  0x30   :  { %s136_s10 = scalar_lea.hbm %s210_s2, 128 }
  0x31   :  { %p137_p7 = scmp.ne.s32.totalorder %s210_s2, %s136_s10  ;;  %p140_p8 = scmp.lt.u32.totalorder %s136_s10, %s210_s2 }
  0x33   :  { %p142_p9 = pnand %p140_p8, %p137_p7 }
  0x35   :  { %145 = shalt.err (!%p142_p9)
}
  0x36   :  { %67 = dma.vmem_to_hbm [thread:$0]  %s65_s7, 128, %s210_s2, [#allocation4]  }
  0x37   :  { %150 = dma.done.wait [#allocation4], 128  }
  0x38   :  { %151 = vsyncadd [#allocation4], 4294967168 }
  0x39   :  { %71 = vsyncpa [#allocation3], 1 }
  0x3a   :  { %72 = vsyncpa [#allocation6], 1 }
  0x3b   :  { %73 = vsyncpa [#allocation4], 1 }

</bundles_post_ra>
